<compile_context>
chip_gen: v7x
topology: tpu7x:2x2x1
jax: 0.10.0
libtpu: 0.0.40
codegen_flags: <defaults>
</compile_context>

<pallas_src>
import jax
import jax.numpy as jnp
from jax.experimental import pallas as pl
from jax.experimental.pallas import tpu as pltpu

_HIGH = jax.lax.Precision.HIGHEST


def _liif_kernel(idx_ref,                       # SMEM (B, Q) int32 (scalar prefetch)
                 feat_ref,                      # VMEM (H*W, C)
                 rel4_ref,                      # VMEM (TQ, 4)
                 w0f_ref, w0r_ref, b0_ref,      # (C, Hp), (4, Hp), (1, Hp)
                 w1_ref, b1_ref,                # (Hp, Hp), (1, Hp)
                 w2_ref, b2_ref,                # (Hp, Op), (1, Op)
                 out_ref,                       # VMEM (TQ, Op)
                 qf_ref):                       # scratch VMEM (TQ, C)
    tq = rel4_ref.shape[0]
    b = pl.program_id(0)
    qbase = pl.program_id(1) * tq

    # ---- nearest-neighbour row gather: q_feat[t] = feat[flat_idx[b, qbase+t]] ----
    def gather_row(t, carry):
        row = idx_ref[b, qbase + t]                         # scalar from SMEM
        qf_ref[pl.ds(t, 1), :] = feat_ref[pl.ds(row, 1), :]
        return carry

    jax.lax.fori_loop(0, tq, gather_row, 0)

    q_feat = qf_ref[...]                                    # (TQ, C)  f32
    rel = rel4_ref[...]                                     # (TQ, 4)  f32

    # ---- imnet MLP (default precision: bf16 MXU passes, f32 accumulation) ----
    h = jnp.dot(q_feat, w0f_ref[...], preferred_element_type=jnp.float32)
    h += b0_ref[...]
    # K=4 coord/cell contribution as 4 VPU broadcast-FMAs (no K=4 MXU pass).
    h += rel[:, 0:1] * w0r_ref[0:1, :]
    h += rel[:, 1:2] * w0r_ref[1:2, :]
    h += rel[:, 2:3] * w0r_ref[2:3, :]
    h += rel[:, 3:4] * w0r_ref[3:4, :]
    h = jnp.maximum(h, 0.0)

    h = jnp.dot(h, w1_ref[...], preferred_element_type=jnp.float32) + b1_ref[...]
    h = jnp.maximum(h, 0.0)

    out = jnp.dot(h, w2_ref[...], preferred_element_type=jnp.float32) + b2_ref[...]
    out_ref[...] = out.astype(out_ref.dtype)                # lane-dense store


def liif_sampler_pallas(feat_nchw, coord, cell, params, *, tq=128):
    """feat_nchw: (B, C, H, W); coord, cell: (B, Q, 2) -> (B, Q, out_dim)."""
    B, C, H, W = feat_nchw.shape
    Q = coord.shape[1]
    assert Q % tq == 0, "Q must be a multiple of the query tile"
    w0, b0, w1, b1, w2, b2 = params
    hidden = w0.shape[1]
    out_dim = w2.shape[1]

    LANE = 128
    hp = ((hidden + LANE - 1) // LANE) * LANE          # lane-padded hidden
    op = ((out_dim + LANE - 1) // LANE) * LANE         # lane-padded out_dim

    # --- glue: NCHW -> channels-last flat (B, H*W, C) ---
    feat_flat = jnp.transpose(feat_nchw, (0, 2, 3, 1)).reshape(B, H * W, C)

    # --- nearest indices (grid_sample nearest, align_corners=False) and the
    #     rel_coord / rel_cell features, precomputed once in plain JAX. ---
    ch, cw = coord[..., 0], coord[..., 1]              # (B, Q)  y(H) / x(W) axes
    ih = jnp.clip(jnp.round(((ch + 1.0) * H - 1.0) * 0.5), 0.0, H - 1.0)
    iw = jnp.clip(jnp.round(((cw + 1.0) * W - 1.0) * 0.5), 0.0, W - 1.0)
    flat_idx = (ih.astype(jnp.int32) * W + iw.astype(jnp.int32)).astype(jnp.int32)
    qch = -1.0 + (2.0 * ih + 1.0) / H                  # make_coord cell centers
    qcw = -1.0 + (2.0 * iw + 1.0) / W
    rel4 = jnp.stack([(ch - qch) * H, (cw - qcw) * W,
                      cell[..., 0] * H, cell[..., 1] * W], axis=-1)  # (B, Q, 4)

    # --- zero-pad the MLP to lane-dense shapes (hidden -> hp, out -> op) ---
    w0f = jnp.pad(w0[:C], ((0, 0), (0, hp - hidden)))
    w0r = jnp.pad(w0[C:], ((0, 0), (0, hp - hidden)))
    b0p = jnp.pad(b0, (0, hp - hidden)).reshape(1, hp)
    w1p = jnp.pad(w1, ((0, hp - hidden), (0, hp - hidden)))
    b1p = jnp.pad(b1, (0, hp - hidden)).reshape(1, hp)
    w2p = jnp.pad(w2, ((0, hp - hidden), (0, op - out_dim)))
    b2p = jnp.pad(b2, (0, op - out_dim)).reshape(1, op)

    grid = (B, Q // tq)
    out = pl.pallas_call(
        _liif_kernel,
        out_shape=jax.ShapeDtypeStruct((B, Q, op), jnp.float32),
        grid_spec=pltpu.PrefetchScalarGridSpec(
            num_scalar_prefetch=1,
            grid=grid,
            in_specs=[
                # feat: resident across the q axis (b-major grid -> one DMA per b)
                pl.BlockSpec((None, H * W, C), lambda b, q, idx: (b, 0, 0)),
                pl.BlockSpec((None, tq, 4), lambda b, q, idx: (b, q, 0)),
                pl.BlockSpec((C, hp), lambda b, q, idx: (0, 0)),
                pl.BlockSpec((4, hp), lambda b, q, idx: (0, 0)),
                pl.BlockSpec((1, hp), lambda b, q, idx: (0, 0)),
                pl.BlockSpec((hp, hp), lambda b, q, idx: (0, 0)),
                pl.BlockSpec((1, hp), lambda b, q, idx: (0, 0)),
                pl.BlockSpec((hp, op), lambda b, q, idx: (0, 0)),
                pl.BlockSpec((1, op), lambda b, q, idx: (0, 0)),
            ],
            out_specs=pl.BlockSpec((None, tq, op), lambda b, q, idx: (b, q, 0)),
            scratch_shapes=[pltpu.VMEM((tq, C), jnp.float32)],
        ),
        compiler_params=pltpu.CompilerParams(
            dimension_semantics=("parallel", "parallel"),
            vmem_limit_bytes=32 * 1024 * 1024),
    )(flat_idx, feat_flat, rel4, w0f, w0r, b0p, w1p, b1p, w2p, b2p)

    return out[..., :out_dim]


def liif_sampler_ref(feat_nchw, coord, cell, params):
    """Pure-JAX reference mirroring the PyTorch forward (f32, HIGHEST precision)."""
    B, C, H, W = feat_nchw.shape
    Q = coord.shape[1]
    ch, cw = coord[..., 0:1], coord[..., 1:2]
    ih = jnp.clip(jnp.round(((ch + 1.0) * H - 1.0) * 0.5), 0.0, H - 1.0)
    iw = jnp.clip(jnp.round(((cw + 1.0) * W - 1.0) * 0.5), 0.0, W - 1.0)
    flat = (ih * W + iw).astype(jnp.int32)                       # (B, Q, 1)
    feat_flat = jnp.transpose(feat_nchw, (0, 2, 3, 1)).reshape(B, H * W, C)
    q_feat = jnp.take_along_axis(
        feat_flat, jnp.broadcast_to(flat, (B, Q, C)), axis=1)    # (B, Q, C)
    qch = -1.0 + (2.0 * ih + 1.0) / H
    qcw = -1.0 + (2.0 * iw + 1.0) / W
    rel = jnp.concatenate([(ch - qch) * H, (cw - qcw) * W,
                           cell[..., 0:1] * H, cell[..., 1:2] * W], axis=-1)
    inp = jnp.concatenate([q_feat, rel], axis=-1)                # (B, Q, C+4)
    w0, b0, w1, b1, w2, b2 = params
    h = jax.nn.relu(jnp.matmul(inp, w0, precision=_HIGH) + b0)
    h = jax.nn.relu(jnp.matmul(h, w1, precision=_HIGH) + b1)
    return jnp.matmul(h, w2, precision=_HIGH) + b2


def init_imnet_params(key, in_dim, hidden, out_dim):
    ks = jax.random.split(key, 6)
    def lin(kw, kb, fi, fo):
        w = jax.random.normal(kw, (fi, fo), jnp.float32) / jnp.sqrt(fi)
        b = 0.1 * jax.random.normal(kb, (fo,), jnp.float32)
        return w, b
    w0, b0 = lin(ks[0], ks[1], in_dim, hidden)
    w1, b1 = lin(ks[2], ks[3], hidden, hidden)
    w2, b2 = lin(ks[4], ks[5], hidden, out_dim)
    return (w0, b0, w1, b1, w2, b2)


if __name__ == "__main__":
    key = jax.random.PRNGKey(0)
    B, C, H, W = 2, 16, 8, 8          # imnet in_dim = C + 4 = 20
    Q, hidden, out_dim = 256, 32, 3
    kf, kc, kl, kp = jax.random.split(key, 4)

    feat = jax.random.normal(kf, (B, C, H, W), jnp.float32)
    coord = jax.random.uniform(kc, (B, Q, 2), jnp.float32,
                               minval=-1.0 + 1e-3, maxval=1.0 - 1e-3)
    cell = jax.random.uniform(kl, (B, Q, 2), jnp.float32,
                              minval=0.02, maxval=0.25)
    params = init_imnet_params(kp, C + 4, hidden, out_dim)

    out = liif_sampler_pallas(feat, coord, cell, params, tq=128)
    jax.block_until_ready(out)

    ref = liif_sampler_ref(feat, coord, cell, params)
    assert out.shape == (B, Q, out_dim)
    assert bool(jnp.all(jnp.isfinite(out)))
    # Kernel matmuls run at default (bf16-on-MXU) precision; reference is
    # f32/HIGHEST, so allow the corresponding truncation error.
    max_err = float(jnp.max(jnp.abs(out - ref)))
    assert max_err < 5e-2, f"mismatch vs reference: max abs err {max_err}"
    print("KERNEL_OK")
</pallas_src>

<mosaic_0001>
module attributes {stable_mosaic.version = 11 : i64} {
  func.func @_liif_kernel(%arg0: i32, %arg1: i32, %arg2: memref<2x256xi32, #tpu.memory_space<smem>>, %arg3: memref<1x64x16xf32, #tpu.memory_space<vmem>>, %arg4: memref<1x128x4xf32, #tpu.memory_space<vmem>>, %arg5: memref<16x128xf32, #tpu.memory_space<vmem>>, %arg6: memref<4x128xf32, #tpu.memory_space<vmem>>, %arg7: memref<1x128xf32, #tpu.memory_space<vmem>>, %arg8: memref<128x128xf32, #tpu.memory_space<vmem>>, %arg9: memref<1x128xf32, #tpu.memory_space<vmem>>, %arg10: memref<128x128xf32, #tpu.memory_space<vmem>>, %arg11: memref<1x128xf32, #tpu.memory_space<vmem>>, %arg12: memref<1x128x128xf32, #tpu.memory_space<vmem>>, %arg13: memref<128x16xf32, #tpu.memory_space<vmem>>) attributes {dimension_semantics = [#tpu.dimension_semantics<parallel>, #tpu.dimension_semantics<parallel>], iteration_bounds = array<i64: 2, 2>, scalar_prefetch = 1 : i64, scratch_operands = 1 : i64, tpu.core_type = #tpu.core_type<tc>, window_params = [{transform_indices = @transform_0, window_bounds = array<i64: 1, 64, 16>}, {transform_indices = @transform_1, window_bounds = array<i64: 1, 128, 4>}, {pipeline_mode = #tpu.pipeline_mode<synchronous>, transform_indices = @transform_2, window_bounds = array<i64: 16, 128>}, {pipeline_mode = #tpu.pipeline_mode<synchronous>, transform_indices = @transform_3, window_bounds = array<i64: 4, 128>}, {pipeline_mode = #tpu.pipeline_mode<synchronous>, transform_indices = @transform_4, window_bounds = array<i64: 1, 128>}, {pipeline_mode = #tpu.pipeline_mode<synchronous>, transform_indices = @transform_5, window_bounds = array<i64: 128, 128>}, {pipeline_mode = #tpu.pipeline_mode<synchronous>, transform_indices = @transform_6, window_bounds = array<i64: 1, 128>}, {pipeline_mode = #tpu.pipeline_mode<synchronous>, transform_indices = @transform_7, window_bounds = array<i64: 128, 128>}, {pipeline_mode = #tpu.pipeline_mode<synchronous>, transform_indices = @transform_8, window_bounds = array<i64: 1, 128>}, {transform_indices = @transform_9, window_bounds = array<i64: 1, 128, 128>}]} {
    %c128_i32 = arith.constant 128 : i32
    %0 = arith.muli %arg1, %c128_i32 : i32
    %c0_i32 = arith.constant 0 : i32
    %c128_i32_0 = arith.constant 128 : i32
    %1 = arith.addi %c0_i32, %c128_i32_0 : i32
    %c1_i32 = arith.constant 1 : i32
    scf.for %arg14 = %c0_i32 to %1 step %c1_i32  : i32 {
      %51 = arith.addi %0, %arg14 : i32
      %52 = arith.index_cast %arg0 : i32 to index
      %53 = arith.index_cast %51 : i32 to index
      %54 = memref.load %arg2[%52, %53] : memref<2x256xi32, #tpu.memory_space<smem>>
      %c0_30 = arith.constant 0 : index
      %55 = arith.index_cast %54 : i32 to index
      %c0_31 = arith.constant 0 : index
      %56 = vector.load %arg3[%c0_30, %55, %c0_31] : memref<1x64x16xf32, #tpu.memory_space<vmem>>, vector<1x1x16xf32>
      %57 = vector.shape_cast %56 : vector<1x1x16xf32> to vector<1x16xf32>
      %58 = arith.index_cast %arg14 : i32 to index
      %c0_32 = arith.constant 0 : index
      %59 = vector.load %arg13[%58, %c0_32] : memref<128x16xf32, #tpu.memory_space<vmem>>, vector<1x16xf32>
      tpu.vector_store %arg13[%58, %c0_32], %57 {strides = array<i32>} : memref<128x16xf32, #tpu.memory_space<vmem>>, vector<1x16xf32>,
    }
    %c128_i32_1 = arith.constant 128 : i32
    %c0 = arith.constant 0 : index
    %c0_2 = arith.constant 0 : index
    %2 = vector.load %arg13[%c0, %c0_2] : memref<128x16xf32, #tpu.memory_space<vmem>>, vector<128x16xf32>
    %c0_3 = arith.constant 0 : index
    %c0_4 = arith.constant 0 : index
    %c0_5 = arith.constant 0 : index
    %3 = vector.load %arg4[%c0_3, %c0_4, %c0_5] : memref<1x128x4xf32, #tpu.memory_space<vmem>>, vector<1x128x4xf32>
    %4 = vector.shape_cast %3 : vector<1x128x4xf32> to vector<128x4xf32>
    %c0_6 = arith.constant 0 : index
    %c0_7 = arith.constant 0 : index
    %5 = vector.load %arg5[%c0_6, %c0_7] : memref<16x128xf32, #tpu.memory_space<vmem>>, vector<16x128xf32>
    %cst = arith.constant dense<0.000000e+00> : vector<128x128xf32>
    %6 = tpu.matmul %2, %5, %cst {dimension_numbers = #tpu.dot_dimension_numbers<[1], [0], [0], [1], [0, 0, 1, 1], [], []>} : vector<128x16xf32>, vector<16x128xf32>, vector<128x128xf32> -> vector<128x128xf32>
    %c0_8 = arith.constant 0 : index
    %c0_9 = arith.constant 0 : index
    %7 = vector.load %arg7[%c0_8, %c0_9] : memref<1x128xf32, #tpu.memory_space<vmem>>, vector<1x128xf32>
    %8 = vector.broadcast %7 : vector<1x128xf32> to vector<128x128xf32>
    %9 = arith.addf %6, %8 : vector<128x128xf32>
    %10 = vector.extract_strided_slice %4 {offsets = [0, 0], sizes = [128, 1], strides = [1, 1]} : vector<128x4xf32> to vector<128x1xf32>
    %c0_10 = arith.constant 0 : index
    %c0_11 = arith.constant 0 : index
    %11 = vector.load %arg6[%c0_10, %c0_11] : memref<4x128xf32, #tpu.memory_space<vmem>>, vector<1x128xf32>
    %12 = vector.broadcast %10 : vector<128x1xf32> to vector<128x128xf32>
    %13 = vector.broadcast %11 : vector<1x128xf32> to vector<128x128xf32>
    %14 = arith.mulf %12, %13 : vector<128x128xf32>
    %15 = arith.addf %9, %14 : vector<128x128xf32>
    %16 = vector.extract_strided_slice %4 {offsets = [0, 1], sizes = [128, 1], strides = [1, 1]} : vector<128x4xf32> to vector<128x1xf32>
    %c1 = arith.constant 1 : index
    %c0_12 = arith.constant 0 : index
    %17 = vector.load %arg6[%c1, %c0_12] : memref<4x128xf32, #tpu.memory_space<vmem>>, vector<1x128xf32>
    %18 = vector.broadcast %16 : vector<128x1xf32> to vector<128x128xf32>
    %19 = vector.broadcast %17 : vector<1x128xf32> to vector<128x128xf32>
    %20 = arith.mulf %18, %19 : vector<128x128xf32>
    %21 = arith.addf %15, %20 : vector<128x128xf32>
    %22 = vector.extract_strided_slice %4 {offsets = [0, 2], sizes = [128, 1], strides = [1, 1]} : vector<128x4xf32> to vector<128x1xf32>
    %c2 = arith.constant 2 : index
    %c0_13 = arith.constant 0 : index
    %23 = vector.load %arg6[%c2, %c0_13] : memref<4x128xf32, #tpu.memory_space<vmem>>, vector<1x128xf32>
    %24 = vector.broadcast %22 : vector<128x1xf32> to vector<128x128xf32>
    %25 = vector.broadcast %23 : vector<1x128xf32> to vector<128x128xf32>
    %26 = arith.mulf %24, %25 : vector<128x128xf32>
    %27 = arith.addf %21, %26 : vector<128x128xf32>
    %28 = vector.extract_strided_slice %4 {offsets = [0, 3], sizes = [128, 1], strides = [1, 1]} : vector<128x4xf32> to vector<128x1xf32>
    %c3 = arith.constant 3 : index
    %c0_14 = arith.constant 0 : index
    %29 = vector.load %arg6[%c3, %c0_14] : memref<4x128xf32, #tpu.memory_space<vmem>>, vector<1x128xf32>
    %30 = vector.broadcast %28 : vector<128x1xf32> to vector<128x128xf32>
    %31 = vector.broadcast %29 : vector<1x128xf32> to vector<128x128xf32>
    %32 = arith.mulf %30, %31 : vector<128x128xf32>
    %33 = arith.addf %27, %32 : vector<128x128xf32>
    %cst_15 = arith.constant 0.000000e+00 : f32
    %34 = vector.broadcast %cst_15 : f32 to vector<128x128xf32>
    %35 = arith.maximumf %33, %34 : vector<128x128xf32>
    %c0_16 = arith.constant 0 : index
    %c0_17 = arith.constant 0 : index
    %36 = vector.load %arg8[%c0_16, %c0_17] : memref<128x128xf32, #tpu.memory_space<vmem>>, vector<128x128xf32>
    %cst_18 = arith.constant dense<0.000000e+00> : vector<128x128xf32>
    %37 = tpu.matmul %35, %36, %cst_18 {dimension_numbers = #tpu.dot_dimension_numbers<[1], [0], [0], [1], [0, 0, 1, 1], [], []>} : vector<128x128xf32>, vector<128x128xf32>, vector<128x128xf32> -> vector<128x128xf32>
    %c0_19 = arith.constant 0 : index
    %c0_20 = arith.constant 0 : index
    %38 = vector.load %arg9[%c0_19, %c0_20] : memref<1x128xf32, #tpu.memory_space<vmem>>, vector<1x128xf32>
    %39 = vector.broadcast %38 : vector<1x128xf32> to vector<128x128xf32>
    %40 = arith.addf %37, %39 : vector<128x128xf32>
    %cst_21 = arith.constant 0.000000e+00 : f32
    %41 = vector.broadcast %cst_21 : f32 to vector<128x128xf32>
    %42 = arith.maximumf %40, %41 : vector<128x128xf32>
    %c0_22 = arith.constant 0 : index
    %c0_23 = arith.constant 0 : index
    %43 = vector.load %arg10[%c0_22, %c0_23] : memref<128x128xf32, #tpu.memory_space<vmem>>, vector<128x128xf32>
    %cst_24 = arith.constant dense<0.000000e+00> : vector<128x128xf32>
    %44 = tpu.matmul %42, %43, %cst_24 {dimension_numbers = #tpu.dot_dimension_numbers<[1], [0], [0], [1], [0, 0, 1, 1], [], []>} : vector<128x128xf32>, vector<128x128xf32>, vector<128x128xf32> -> vector<128x128xf32>
    %c0_25 = arith.constant 0 : index
    %c0_26 = arith.constant 0 : index
    %45 = vector.load %arg11[%c0_25, %c0_26] : memref<1x128xf32, #tpu.memory_space<vmem>>, vector<1x128xf32>
    %46 = vector.broadcast %45 : vector<1x128xf32> to vector<128x128xf32>
    %47 = arith.addf %44, %46 : vector<128x128xf32>
    %c0_27 = arith.constant 0 : index
    %c0_28 = arith.constant 0 : index
    %c0_29 = arith.constant 0 : index
    %48 = vector.load %arg12[%c0_27, %c0_28, %c0_29] : memref<1x128x128xf32, #tpu.memory_space<vmem>>, vector<1x128x128xf32>
    %49 = vector.shape_cast %48 : vector<1x128x128xf32> to vector<128x128xf32>
    %50 = vector.shape_cast %47 : vector<128x128xf32> to vector<1x128x128xf32>
    tpu.vector_store %arg12[%c0_27, %c0_28, %c0_29], %50 {strides = array<i32>} : memref<1x128x128xf32, #tpu.memory_space<vmem>>, vector<1x128x128xf32>,
    return
  }
  func.func @transform_0(%arg0: i32, %arg1: i32, %arg2: memref<2x256xi32, #tpu.memory_space<smem>>) -> (i32, i32, i32) {
    %c0_i32 = arith.constant 0 : i32
    %c0_i32_0 = arith.constant 0 : i32
    %c0_i32_1 = arith.constant 0 : i32
    return %arg0, %c0_i32, %c0_i32_0 : i32, i32, i32
  }
  func.func @transform_1(%arg0: i32, %arg1: i32, %arg2: memref<2x256xi32, #tpu.memory_space<smem>>) -> (i32, i32, i32) {
    %c0_i32 = arith.constant 0 : i32
    %c0_i32_0 = arith.constant 0 : i32
    return %arg0, %arg1, %c0_i32 : i32, i32, i32
  }
  func.func @transform_2(%arg0: i32, %arg1: i32, %arg2: memref<2x256xi32, #tpu.memory_space<smem>>) -> (i32, i32) {
    %c0_i32 = arith.constant 0 : i32
    %c0_i32_0 = arith.constant 0 : i32
    %c0_i32_1 = arith.constant 0 : i32
    return %c0_i32, %c0_i32_0 : i32, i32
  }
  func.func @transform_3(%arg0: i32, %arg1: i32, %arg2: memref<2x256xi32, #tpu.memory_space<smem>>) -> (i32, i32) {
    %c0_i32 = arith.constant 0 : i32
    %c0_i32_0 = arith.constant 0 : i32
    %c0_i32_1 = arith.constant 0 : i32
    return %c0_i32, %c0_i32_0 : i32, i32
  }
  func.func @transform_4(%arg0: i32, %arg1: i32, %arg2: memref<2x256xi32, #tpu.memory_space<smem>>) -> (i32, i32) {
    %c0_i32 = arith.constant 0 : i32
    %c0_i32_0 = arith.constant 0 : i32
    %c0_i32_1 = arith.constant 0 : i32
    return %c0_i32, %c0_i32_0 : i32, i32
  }
  func.func @transform_5(%arg0: i32, %arg1: i32, %arg2: memref<2x256xi32, #tpu.memory_space<smem>>) -> (i32, i32) {
    %c0_i32 = arith.constant 0 : i32
    %c0_i32_0 = arith.constant 0 : i32
    %c0_i32_1 = arith.constant 0 : i32
    return %c0_i32, %c0_i32_0 : i32, i32
  }
  func.func @transform_6(%arg0: i32, %arg1: i32, %arg2: memref<2x256xi32, #tpu.memory_space<smem>>) -> (i32, i32) {
    %c0_i32 = arith.constant 0 : i32
    %c0_i32_0 = arith.constant 0 : i32
    %c0_i32_1 = arith.constant 0 : i32
    return %c0_i32, %c0_i32_0 : i32, i32
  }
  func.func @transform_7(%arg0: i32, %arg1: i32, %arg2: memref<2x256xi32, #tpu.memory_space<smem>>) -> (i32, i32) {
    %c0_i32 = arith.constant 0 : i32
    %c0_i32_0 = arith.constant 0 : i32
    %c0_i32_1 = arith.constant 0 : i32
    return %c0_i32, %c0_i32_0 : i32, i32
  }
  func.func @transform_8(%arg0: i32, %arg1: i32, %arg2: memref<2x256xi32, #tpu.memory_space<smem>>) -> (i32, i32) {
    %c0_i32 = arith.constant 0 : i32
    %c0_i32_0 = arith.constant 0 : i32
    %c0_i32_1 = arith.constant 0 : i32
    return %c0_i32, %c0_i32_0 : i32, i32
  }
  func.func @transform_9(%arg0: i32, %arg1: i32, %arg2: memref<2x256xi32, #tpu.memory_space<smem>>) -> (i32, i32, i32) {
    %c0_i32 = arith.constant 0 : i32
    %c0_i32_0 = arith.constant 0 : i32
    return %arg0, %arg1, %c0_i32 : i32, i32, i32
  }
}

</mosaic_0001>

<bundles_post_ra>
// kernel: tpu_custom_call.1
= control target key start
LH: loop header
LB: loop body
LE: loop exit
PB: predicated region body
PF: predicated region fallthrough
CT: control target
= control target key end

     0   :  { %s2841_s0 = inlined_call_operand.vmem [shape: s32[2,256], index: 0, kind: input, shape index: {}]   ;;  %s2842_s1 = inlined_call_operand.vmem [shape: f32[2,64,16], index: 1, kind: input, shape index: {}]   ;;  %s2843_s2 = inlined_call_operand.vmem [shape: f32[2,256,4], index: 2, kind: input, shape index: {}]   ;;  %s2844_s3 = inlined_call_operand.vmem [shape: f32[16,128], index: 3, kind: input, shape index: {}]   ;;  %s2845_s4 = inlined_call_operand.vmem [shape: f32[4,128], index: 4, kind: input, shape index: {}]   ;;  %s2846_s5 = inlined_call_operand.vmem [shape: f32[1,128], index: 5, kind: input, shape index: {}]   ;;  %s2847_s6 = inlined_call_operand.vmem [shape: f32[128,128], index: 6, kind: input, shape index: {}]   ;;  %s2848_s7 = inlined_call_operand.vmem [shape: f32[1,128], index: 7, kind: input, shape index: {}]   ;;  %s2849_s8 = inlined_call_operand.vmem [shape: f32[128,128], index: 8, kind: input, shape index: {}]   ;;  %s2850_s9 = inlined_call_operand.vmem [shape: f32[1,128], index: 9, kind: input, shape index: {}]   ;;  %s2851_s10 = inlined_call_operand.hbm [shape: f32[2,256,128], index: 10, kind: output, shape index: {}]  }
   0x1   :  { %2862 = sst [smem:[#allocation18_spill]] %s2842_s1  ;;  %s15_s15 = sshll.u32 %s2841_s0, 4  ;;  %s16_s15 = int_to_ptr.vmem [resolvable:$true] %s15_s15 }
   0x2   :  { %2863 = sst [smem:[#allocation19_spill]] %s2843_s2  ;;  %s2029_s16 = scalar_lea.vmem %s16_s15, 64 }
   0x3   :  { %p2030_p0 = scmp.ne.s32.totalorder %s16_s15, %s2029_s16  ;;  %p2034_p1 = scmp.lt.s32.totalorder %s16_s15, %s16_s15 }
   0x4   :  { %p2035_p2 = scmp.lt.s32.totalorder %s2029_s16, %s2029_s16 }
   0x6   :  { %p2036_p3 = por %p2035_p2, %p2034_p1 }
   0x8   :  { %p2037_p4 = pnand %p2036_p3, %p2030_p0 }
   0xa   :  { %2040 = shalt.err (!%p2037_p4)  }
   0xb   :  { %s2147_s17 = smov [#allocation4]  }
   0xc   :  { %18 = dma.vmem_to_smem %s16_s15, 64, %s2147_s17, [#allocation3] }
   0xd   :  { %2105 = dma.done.wait [#allocation3], 64 }
   0xe   :  { %2106 = vsyncadd [#allocation3], 4294967232 }
   0xf   :  { %20 = sfence }
  0x10   :  { %21 = vsyncpa [#allocation6], 0 }
  0x11   :  { %23 = vsyncpa [#allocation6 + $0x1], 0  ;;  %s2213_s18 = smov 0   ;;  %s2215_s19 = smov 0  }
  0x12   :  { %s2217_s0 = smov 0   ;;  %s2219_s20 = smov 0  }
  0x13   :  { %s2221_s21 = smov 0   ;;  %s2223_s22 = smov 0  }
  0x14   :  { %s2225_s23 = smov 0   ;;  %s2227_s24 = smov 0  }
  0x15 LB: > { %2864 = sst [smem:[#allocation9_spill]] %s2113_s18  ;;  %s1573_s25 = sadd.s32 4294967295, %s2141_s24   ;;  %s2141_s24 = sphi %s2227_s24, %s29_s24   ;;  %s2137_s23 = sphi %s2225_s23, %s2886_s23   ;;  %s2133_s22 = sphi %s2223_s22, %s2885_s22   ;;  %s2129_s21 = sphi %s2221_s21, %s2889_s21   ;;  %s2125_s20 = sphi %s2219_s20, %s2883_s20   ;;  %s2121_s0 = sphi %s2217_s0, %s2882_s0   ;;  %s2117_s19 = sphi %s2215_s19, %s2888_s19   ;;  %s2113_s18 = sphi %s2213_s18, %s2887_s18  }
  0x16   : > { %2865 = sst [smem:[#allocation10_spill]] %s2121_s0  ;;  %s1574_s26 = sadd.s32 4294967294, %s2141_s24  }
  0x17   : > { %2866 = sst [smem:[#allocation11_spill]] %s2133_s22  ;;  %s38_s27 = sadd.s32 1, %s2133_s22 }
  0x18   : > { %2867 = sst [smem:[#allocation12_spill]] %s2137_s23  ;;  %p39_p5 = scmp.ge.s32.totalorder %s38_s27, 2 }
  0x19   : > { %2868 = sst [smem:[#allocation13_spill]] %s2141_s24  ;;  %s41_s28 = sadd.s32 1, %s2137_s23 }
  0x1a   : > { %p261_p6 = scmp.ne.s32.totalorder %s2121_s0, %s2117_s19  ;;  %p262_p7 = scmp.eq.s32.totalorder %s1573_s25, 3 }
  0x1b   : > { %s2891_s27 = smov (%p39_p5, %s38_s27), 0  ;;  %s2893_s28 = smov (!%p39_p5, %s41_s28), %s2137_s23 }
  0x1c   : > { %2869 = sst [smem:[#allocation14_spill]] %s2891_s27  ;;  %s247_s29 = ssub.s32 %s2133_s22, %s2891_s27 }
  0x1d   : > { %p2264_p8 = por %p262_p7, %p261_p6  ;;  %p43_p9 = scmp.ge.s32.totalorder %s2893_s28, 2 }
  0x1e   : > { %p267_p10 = scmp.ne.s32.totalorder %s2117_s19, %s2113_s18  ;;  %p268_p11 = scmp.eq.s32.totalorder %s1574_s26, 3 }
  0x1f   : > { %p1577_p12 = scmp.ge.s32.totalorder %s2141_s24, 1  ;;  %s2895_s28 = smov (%p43_p9, %s2893_s28), 0 }
  0x20   : > { %2871 = sst [smem:[#allocation15_spill]] %s2895_s28  ;;  %p2273_p13 = por %p268_p11, %p267_p10 }
  0x21   : > { %p328_p0 = scmp.lt.s32.totalorder %s2141_s24, 5  ;;  %s246_s12 = ssub.s32 %s2137_s23, %s2895_s28 }
  0x22   : > { %s2872_s11 = scalar_select %p2273_p13, 1, 0 }
  0x23   : > { %s251_s13 = sadd.s32 1, %s2121_s0  ;;  %s248_s14 = sor.u32 %s247_s29, %s246_s12 }
  0x24   : > { %2873 = sst [smem:[#allocation16_spill]] %s2872_s11  ;;  %p329_p1 = pnand %p1577_p12, %p328_p0 }
  0x25   : > { %p249_p2 = scmp.eq.s32.totalorder %s248_s14, 0  ;;  %s2858_s16 = sand.u32 (!%p329_p1), 1, %s2117_s19  }
  0x26   : > { %332 = sbr.rel (%p329_p1) target bundleno = 832 (0x340), region = 56  ;;  %p373_p3 = scmp.lt.s32.totalorder (!%p329_p1), %s2129_s21, 1 }
  0x27   : > { %s2282_s15 = scalar_select %p249_p2, %s2121_s0, %s251_s13  }
  0x28   : > { %s1578_s17 = sshll.u32 (!%p329_p1), %s2858_s16, 7  ;;  %s2289_s25 = sshll.u32 (!%p329_p1), %s2125_s20, 4 }
  0x29   : > { %2874 = sst [smem:[#allocation17_spill]] %s2282_s15  ;;  %p381_p4 = scmp.lt.s32.totalorder (!%p329_p1), %s2289_s25, 31 }
  0x2a   : > { %s2875_s1 = sld [smem:[#allocation18_spill]] (!%p329_p1)  ;;  %s1584_s15 = sshll.u32 (!%p329_p1), %s2125_s20, 7 }
  0x2b   : > { %s2876_s2 = sld [smem:[#allocation19_spill]] (!%p329_p1)  ;;  %s2305_s18 = scalar_lea.vmem (!%p329_p1), [#allocation5], %s1578_s17 }
  0x2c   : > { %s2143_s24 = smov (!%p329_p1), 0  }
  0x2d   : > { %s374_s26 = scalar_select %p373_p3, %s2129_s21, 1 }
  0x2e   : > { %s382_s29 = scalar_select %p381_p4, %s2289_s25, 31 }
  0x2f   : > { %s1617_s12 = sshll.u32 %s374_s26, 6  ;;  %s1582_s13 = sshll.u32 %s374_s26, 5 }
  0x30   : > { %s2297_s27 = scalar_lea.vmem %s2875_s1, %s1617_s12  ;;  %s384_s23 = sadd.s32 %s1582_s13, %s382_s29 }
  0x31   : > { %s1583_s22 = sshll.u32 %s384_s23, 3 }
  0x32   : > { %s2303_s16 = scalar_lea.vmem %s2876_s2, %s1583_s22 }
  0x33 LB: >> { %s399_s28 = sshra.s32 %s2129_s21, 1  ;;  %s396_s12 = sadd.s32 %s2145_s24, %s1584_s15  ;;  %vm415_vm0 = vcmask 122880   ;;  %s2145_s24 = sphi %s2143_s24, %s395_s24  }
  0x34   : >> { %s1585_s26 = sshll.u32 %s399_s28, 1  ;;  %s405_s29 = sand.u32 1, %s2129_s21 }
  0x35   : >> { %s397_s23 = sshra.s32 %s396_s12, 7  ;;  %s407_s20 = sand.u32 127, %s396_s12 }
  0x36   : >> { %s402_s13 = sadd.s32 %s1585_s26, %s397_s23  ;;  %s1587_s14 = sshll.u32 %s405_s29, 7 }
  0x37   : >> { %s1586_s0 = sshll.u32 %s402_s13, 8  ;;  %s409_s22 = sadd.s32 %s1587_s14, %s407_s20 }
  0x38   : >> { %s410_s11 = sadd.s32 %s1586_s0, %s409_s22  ;;  %s414_s2 = scalar_lea.vmem [#allocation2], %s2145_s24 }
  0x39   : >> { %s411_s17 = sld [smem:[#allocation4 + %s410_s11]]  ;;  %s395_s24 = sadd.s32 1, %s2145_s24  }
  0x3a   : >> { %p392_p5 = scmp.ge.s32.totalorder %s395_s24, 128  }
  0x3b   : > { %v433_v1 = vld [vmem:[%s2303_s16] sm:$0xff] (%p392_p5)  ;;  %v450_v3 = vld [vmem:[%s2844_s3 + $0x8] sm:$0xff] (%p392_p5)  ;;  %vm458_vm1 = vcmask (%p392_p5), 130048   ;;  %v2148_v4 = vmov (%p392_p5), 1   ;;  %v2149_v8 = vmov (%p392_p5), 3   ;;  %v2322_v11 = vld [vmem:[%s2303_s16 + $0x10] sm:$0xff] (%p392_p5) }
  0x3c   : > { %394 = sbr.rel (!%p392_p5) target bundleno = 51 (0x33), region = 103  ;;  %v449_v2 = vld [vmem:[%s2844_s3] sm:$0xff] (%p392_p5)  ;;  %1994 = vset.pattern.permute.xlu1 (%p392_p5), %v2148_v4  ;;  %v434_v7 = vld [vmem:[%s2303_s16 + $0x8] sm:$0xff] (%p392_p5)  ;;  %1998 = vset.pattern.permute.xlu0 (%p392_p5), %v2149_v8  ;;  %v2328_v14 = vld [vmem:[%s2303_s16 + $0x38] sm:$0xff] (%p392_p5)  ;;  %v2150_v15 = vmov (%p392_p5), 2   ;;  %v2151_v23 = vmov (%p392_p5), 0  }
  0x3d   : > { %v1840_v5 = vpack.c.bf16 (%p392_p5), %v450_v3, %v449_v2  ;;  %771 = vperm.xlu1 (%p392_p5), %1994, %v433_v1   ;;  %977 = vperm.xlu0 (%p392_p5), %1998, %v434_v7   ;;  %v2335_v18 = vld [vmem:[%s2303_s16 + $0x40] sm:$0xff] (%p392_p5)  ;;  %v436_v24 = vld [vmem:[%s2303_s16 + $0x18] sm:$0xff] (%p392_p5)  ;;  %v438_v31 = vld [vmem:[%s2303_s16 + $0x28] sm:$0xff] (%p392_p5)  ;;  %s1613_s13 = sshll.u32 (%p392_p5), %s2129_s21, 5  ;;  %s1472_s22 = sshll.u32 (%p392_p5), %s2305_s18, 4  ;;  %s2783_s22 = int_to_ptr.vmem [resolvable:$true] %s1472_s22 }
  0x3e   : > { %v437_v27 = vld [vmem:[%s2303_s16 + $0x20] sm:$0xff] (%p392_p5)  ;;  %v2360_v32 = vld [vmem:[%s2303_s16 + $0x30] sm:$0xff] (%p392_p5)  ;;  %v2365_v33 = vld [vmem:[%s2303_s16 + $0x58] sm:$0xff] (%p392_p5)  ;;  %s1469_s14 = sadd.s32 (%p392_p5), %s1613_s13, %s2289_s25  ;;  %s2877_s21 = sand.u32 (%p392_p5), 1, %s2117_s19  }
  0x3f   : >> { %s412_s1 = scalar_lea.vmem %s2297_s27, %s411_s17  ;;  %1841 = vmatprep.subr.bf16.mxu0 (%p392_p5), %v1840_v5  ;;  %v2369_v34 = vld [vmem:[%s2303_s16 + $0x60] sm:$0xff] (%p392_p5)  ;;  %v1089_v36 = vld [vmem:[%s2847_s6 + $0x8] sm:$0xff] (%p392_p5)  ;;  %v1090_v38 = vld [vmem:[%s2847_s6 + $0x10] sm:$0xff] (%p392_p5)  ;;  %s1614_s0 = sshll.u32 (%p392_p5), %s1469_s14, 7 }
  0x40   : >> { %v413_v0 = vld [vmem:[%s412_s1] sm:$0x1]  ;;  %1843 = vmatpush3.bf16.msra.mxu0 (%p392_p5), %v1840_v5  ;;  %v1091_v39 = vld [vmem:[%s2847_s6 + $0x18] sm:$0xff] (%p392_p5)  ;;  %v1093_v42 = vld [vmem:[%s2847_s6 + $0x28] sm:$0xff] (%p392_p5)  ;;  %s2781_s28 = scalar_lea.hbm (%p392_p5), %s2851_s10, %s1614_s0  ;;  %s2789_s25 = scalar_lea.sflag (%p392_p5), [#allocation6], %s2877_s21 }
  0x41   : >> { %416 = vst.msk [vmem:[%s414_s2] sm:$0x1] %vm415_vm0, %v413_v0  ;;  %775 = vperm.xlu1 (%p392_p5), %1994, %v434_v7   ;;  %981 = vperm.xlu0 (%p392_p5), %1998, %v2322_v11   ;;  %v1088_v35 = vld [vmem:[%s2847_s6] sm:$0xff] (%p392_p5)  ;;  %v1848_v40 = vpack.c.bf16 (%p392_p5), %v1091_v39, %v1090_v38  ;;  %v1094_v44 = vld [vmem:[%s2847_s6 + $0x30] sm:$0xff] (%p392_p5)  ;;  %v1095_v45 = vld [vmem:[%s2847_s6 + $0x38] sm:$0xff] (%p392_p5)  ;;  %s2041_s12 = scalar_lea.vmem (%p392_p5), %s2783_s22, 2048 }
  0x42   : > { %v1844_v37 = vpack.c.bf16 (%p392_p5), %v1089_v36, %v1088_v35  ;;  %v1092_v41 = vld [vmem:[%s2847_s6 + $0x20] sm:$0xff] (%p392_p5)  ;;  %v442_v46 = vld [vmem:[%s2303_s16 + $0x48] sm:$0xff] (%p392_p5)  ;;  %v1856_v48 = vpack.c.bf16 (%p392_p5), %v1095_v45, %v1094_v44  ;;  %v2425_v51 = vld [vmem:[%s2303_s16 + $0x70] sm:$0xff] (%p392_p5)  ;;  %p2042_p6 = scmp.ne.s32.totalorder (%p392_p5), %s2783_s22, %s2041_s12 }
  0x43   : > { %v1852_v43 = vpack.c.bf16 %v1093_v42, %v1092_v41  ;;  %v2415_v47 = vld [vmem:[%s2303_s16 + $0x68] sm:$0xff]  ;;  %v1096_v49 = vld [vmem:[%s2847_s6 + $0x40] sm:$0xff]  ;;  %v1098_v53 = vld [vmem:[%s2847_s6 + $0x50] sm:$0xff] }
  0x44   : > { %1845 = vmatprep.subr.bf16.mxu1 %v1844_v37  ;;  %v1097_v50 = vld [vmem:[%s2847_s6 + $0x48] sm:$0xff]  ;;  %v1099_v54 = vld [vmem:[%s2847_s6 + $0x58] sm:$0xff]  ;;  %v1100_v56 = vld [vmem:[%s2847_s6 + $0x60] sm:$0xff]  ;;  %p2043_p7 = pnand %p2042_p6, %p2264_p8 }
  0x45   : > { %1995 = vset.pattern.permute.xlu1 %v2150_v15  ;;  %1001 = vperm.xlu0 %1998, %v2328_v14   ;;  %v1860_v52 = vpack.c.bf16 %v1097_v50, %v1096_v49  ;;  %v1864_v55 = vpack.c.bf16 %v1099_v54, %v1098_v53  ;;  %v1101_v57 = vld [vmem:[%s2847_s6 + $0x68] sm:$0xff]  ;;  %v1102_v59 = vld [vmem:[%s2847_s6 + $0x70] sm:$0xff]  ;;  %v1103_v60 = vld [vmem:[%s2847_s6 + $0x78] sm:$0xff] }
  0x46   : > { %872 = vperm.xlu1 %1995, %v433_v1   ;;  %1847 = vmatpush3.bf16.msra.mxu1 %v1844_v37  ;;  %v1868_v58 = vpack.c.bf16 %v1101_v57, %v1100_v56  ;;  %v1872_v61 = vpack.c.bf16 %v1103_v60, %v1102_v59  ;;  %v443_v62 = vld [vmem:[%s2303_s16 + $0x50] sm:$0xff]  ;;  %v1277_v35 = vld [vmem:[%s2849_s8 + $0x28] sm:$0xff]  ;;  %v1283_v49 = vld [vmem:[%s2849_s8 + $0x58] sm:$0xff]  ;;  %p2044_p9 = pneg %p2043_p7 }
  0x47   : > { %1849 = vmatprep.subr.bf16.mxu1 %v1848_v40  ;;  %v1278_v39 = vld [vmem:[%s2849_s8 + $0x30] sm:$0xff]  ;;  %v1281_v44 = vld [vmem:[%s2849_s8 + $0x48] sm:$0xff]  ;;  %v1284_v53 = vld [vmem:[%s2849_s8 + $0x60] sm:$0xff] }
  0x48   : > { %v417_v6 = vld [vmem:[#allocation2] sm:$0xff]  ;;  %v418_v9 = vld [vmem:[#allocation2 + $0x8] sm:$0xff]  ;;  %v419_v10 = vld [vmem:[#allocation2 + $0x10] sm:$0xff] }
  0x49   : > { %1704 = vmatprep.mubr.msk.f32.mxu0 %vm458_vm1, %v417_v6  ;;  %v420_v12 = vld [vmem:[#allocation2 + $0x18] sm:$0xff]  ;;  %v421_v13 = vld [vmem:[#allocation2 + $0x20] sm:$0xff]  ;;  %v422_v16 = vld [vmem:[#allocation2 + $0x28] sm:$0xff]  ;;  %1005 = vperm.xlu0 %1998, %v2335_v18  }
  0x4a   : > { %1705 = vmatmul.mubr.msk.f32.vlgmr.msra.gmra.mrb[0].mxu0 %vm458_vm1, %v418_v9  ;;  %v423_v17 = vld [vmem:[#allocation2 + $0x30] sm:$0xff]  ;;  %876 = vperm.xlu1 %1995, %v434_v7   ;;  %v424_v19 = vld [vmem:[#allocation2 + $0x38] sm:$0xff]  ;;  %v425_v20 = vld [vmem:[#allocation2 + $0x40] sm:$0xff] }
  0x4b   : > { %1707 = vmatprep.mubr.msk.f32.mxu0 %vm458_vm1, %v419_v10  ;;  %v426_v21 = vld [vmem:[#allocation2 + $0x48] sm:$0xff]  ;;  %v427_v22 = vld [vmem:[#allocation2 + $0x50] sm:$0xff]  ;;  %v428_v25 = vld [vmem:[#allocation2 + $0x58] sm:$0xff]  ;;  %1851 = vmatpush3.bf16.msra.mxu1 %v1848_v40 }
  0x4c   : > { %v429_v26 = vld [vmem:[#allocation2 + $0x60] sm:$0xff]  ;;  %v430_v28 = vld [vmem:[#allocation2 + $0x68] sm:$0xff]  ;;  %v431_v29 = vld [vmem:[#allocation2 + $0x70] sm:$0xff]  ;;  %1853 = vmatprep.subr.bf16.mxu1 %v1852_v43 }
  0x4d   : > { %2014 = vset.pattern.permute.xlu0 %v2151_v23  ;;  %v432_v30 = vld [vmem:[#allocation2 + $0x78] sm:$0xff]  ;;  %v1285_v54 = vld [vmem:[%s2849_s8 + $0x68] sm:$0xff]  ;;  %v2599_v56 = vld [vmem:[%s2845_s4] ss:$0 sm:$0xff] }
  0x4e   : > { %1708 = vmatmul.mubr.msk.f32.gmra.mrb[2].mxu0 %vm458_vm1, %v420_v12  ;;  %1996 = vset.pattern.permute.xlu1 %v2149_v8  ;;  %v1279_v40 = vld [vmem:[%s2849_s8 + $0x38] sm:$0xff]  ;;  %v2604_v57 = vld [vmem:[%s2846_s5] ss:$0 sm:$0xff]  ;;  %v2616_v60 = vld [vmem:[%s2845_s4 + $0x3] ss:$0 sm:$0xff] }
  0x4f   : > { %1710 = vmatprep.mubr.msk.f32.mxu0 %vm458_vm1, %v421_v13  ;;  %973 = vperm.xlu1 %1996, %v433_v1   ;;  %v1888_v42 = vpack.c.bf16 %v1279_v40, %v1278_v39 }
  0x50   : > { %655 = vperm.xlu0 %2014, %v433_v1   ;;  %1855 = vmatpush3.bf16.msra.mxu1 %v1852_v43  ;;  %v1280_v43 = vld [vmem:[%s2849_s8 + $0x40] sm:$0xff] }
  0x51   : > { %1857 = vmatprep.subr.bf16.mxu1 %v1856_v48 }
  0x52   : > { %1711 = vmatmul.mubr.msk.f32.gmra.mrb[4].mxu0 %vm458_vm1, %v422_v16 }
  0x53   : > { %1713 = vmatprep.mubr.msk.f32.mxu0 %vm458_vm1, %v423_v17  ;;  %1997 = vset.pattern.permute.xlu1 %v2148_v4 }
  0x54   : > { %783 = vperm.xlu1 %1997, %v436_v24   ;;  %660 = vperm.xlu0 %2014, %v434_v7  }
  0x55   : > { %1859 = vmatpush3.bf16.msra.mxu1 %v1856_v48  ;;  %v1282_v48 = vld [vmem:[%s2849_s8 + $0x50] sm:$0xff] }
  0x56   : > { %1714 = vmatmul.mubr.msk.f32.gmra.mrb[6].mxu0 %vm458_vm1, %v424_v19  ;;  %1861 = vmatprep.subr.bf16.mxu1 %v1860_v52 }
  0x57   : > { %1716 = vmatprep.mubr.msk.f32.mxu0 %vm458_vm1, %v425_v20 }
  0x58   : > { %1999 = vset.pattern.permute.xlu1 %v2151_v23  ;;  %665 = vperm.xlu0 %2014, %v2322_v11  }
  0x59   : > { %675 = vperm.xlu1 %1999, %v437_v27   ;;  %1863 = vmatpush3.bf16.msra.mxu1 %v1860_v52 }
  0x5a   : > { %1717 = vmatmul.mubr.msk.f32.gmra.mrb[8].mxu0 %vm458_vm1, %v426_v21  ;;  %1865 = vmatprep.subr.bf16.mxu1 %v1864_v55 }
  0x5b   : > { %1719 = vmatprep.mubr.msk.f32.mxu0 %vm458_vm1, %v427_v22 }
  0x5c   : > { %670 = vperm.xlu0 %2014, %v436_v24  }
  0x5d   : > { %2000 = vset.pattern.permute.xlu1 %v2150_v15  ;;  %1867 = vmatpush3.bf16.msra.mxu1 %v1864_v55  ;;  %v2594_v55 = vld [vmem:[%s2845_s4 + $0x1] ss:$0 sm:$0xff] }
  0x5e   : > { %1720 = vmatmul.mubr.msk.f32.gmra.mrb[10].mxu0 %vm458_vm1, %v428_v25  ;;  %880 = vperm.xlu1 %2000, %v2322_v11  }
  0x5f   : > { %1722 = vmatprep.mubr.msk.f32.mxu0 %vm458_vm1, %v429_v26  ;;  %1869 = vmatprep.subr.bf16.mxu1 %v1868_v58 }
  0x60   : > { %680 = vperm.xlu0 %2014, %v438_v31  }
  0x61   : > { %1871 = vmatpush3.bf16.msra.mxu1 %v1868_v58  ;;  %v2609_v58 = vld [vmem:[%s2845_s4 + $0x2] ss:$0 sm:$0xff] }
  0x62   : > { %1723 = vmatmul.mubr.msk.f32.gmra.mrb[12].mxu0 %vm458_vm1, %v430_v28  ;;  %884 = vperm.xlu1 %2000, %v436_v24  }
  0x63   : > { %1725 = vmatprep.mubr.msk.f32.mxu0 %vm458_vm1, %v431_v29  ;;  %1873 = vmatprep.subr.bf16.mxu1 %v1872_v61 }
  0x64   : > { %685 = vperm.xlu0 %2014, %v2360_v32  }
  0x65   : > { %1875 = vmatpush3.bf16.msra.mxu1 %v1872_v61 }
  0x66   : > { %1726 = vmatmul.mubr.msk.f32.gmra.mrb[14].mxu0 %vm458_vm1, %v432_v30  ;;  %2001 = vset.pattern.permute.xlu1 %v2148_v4  ;;  %v1273_v30 = vld [vmem:[%s2849_s8 + $0x8] sm:$0xff] }
  0x67   : > { %787 = vperm.xlu1 %2001, %v437_v27  }
  0x68   : > { %710 = vperm.xlu0 %2014, %v2365_v33  }
  0x6b   : > { %791 = vperm.xlu1 %2001, %v438_v31  }
  0x6c   : > { %715 = vperm.xlu0 %2014, %v2369_v34  }
  0x6f   : > { %2002 = vset.pattern.permute.xlu1 %v2149_v8 }
  0x70   : > { %985 = vperm.xlu1 %2002, %v436_v24   ;;  %2016 = vset.pattern.permute.xlu0 %v2150_v15 }
  0x71   : > { %892 = vperm.xlu0 %2016, %v438_v31  }
  0x74   : > { %2003 = vset.pattern.permute.xlu1 %v2150_v15 }
  0x75   : > { %888 = vperm.xlu1 %2003, %v437_v27   ;;  %896 = vperm.xlu0 %2016, %v2360_v32  }
  0x79   : > { %2004 = vset.pattern.permute.xlu1 %v2151_v23  ;;  %916 = vperm.xlu0 %2016, %v2365_v33  }
  0x7a   : > { %690 = vperm.xlu1 %2004, %v2328_v14  }
  0x7d   : > { %920 = vperm.xlu0 %2016, %v2369_v34  }
  0x7e   : > { %2005 = vset.pattern.permute.xlu1 %v2148_v4 }
  0x7f   : > { %795 = vperm.xlu1 %2005, %v2360_v32  }
  0x81   : > { %2022 = vset.pattern.permute.xlu0 %v2148_v4 }
  0x82   : > { %779 = vperm.xlu0 %2022, %v2322_v11  }
  0x83   : > { %2006 = vset.pattern.permute.xlu1 %v2149_v8 }
  0x84   : > { %989 = vperm.xlu1 %2006, %v437_v27  }
  0x86   : > { %799 = vperm.xlu0 %2022, %v2328_v14  }
  0x88   : > { %993 = vperm.xlu1 %2006, %v438_v31  }
  0x8a   : > { %803 = vperm.xlu0 %2022, %v2335_v18  }
  0x8c   : > { %2007 = vset.pattern.permute.xlu1 %v2151_v23 }
  0x8d   : > { %695 = vperm.xlu1 %2007, %v2335_v18  }
  0x8e   : > { %823 = vperm.xlu0 %2022, %v2415_v47  }
  0x91   : > { %700 = vperm.xlu1 %2007, %v442_v46  }
  0x92   : > { %827 = vperm.xlu0 %2022, %v2425_v51  }
  0x95   : > { %2008 = vset.pattern.permute.xlu1 %v2150_v15 }
  0x96   : > { %900 = vperm.xlu1 %2008, %v2328_v14   ;;  %2026 = vset.pattern.permute.xlu0 %v2149_v8  ;;  %v448_v14 = vld [vmem:[%s2303_s16 + $0x78] sm:$0xff]  ;;  %s2152_s16 = smov [#allocation5]  }
  0x97   : > { %1025 = vperm.xlu0 %2026, %v2415_v47   ;;  %s2045_s26 = sshll.u32 %s2152_s16, 4  ;;  %s2046_s26 = int_to_ptr.vmem [resolvable:$false] %s2045_s26 }
  0x98   : > { %s2047_s29 = scalar_lea.vmem %s2046_s26, 4096  ;;  %p2048_p10 = scmp.lt.s32.totalorder %s2783_s22, %s2046_s26 }
  0x99   : > { %p2049_p11 = scmp.lt.s32.totalorder %s2047_s29, %s2041_s12 }
  0x9a   : > { %2009 = vset.pattern.permute.xlu1 %v2149_v8 }
  0x9b   : > { %997 = vperm.xlu1 %2009, %v2360_v32   ;;  %1029 = vperm.xlu0 %2026, %v2425_v51   ;;  %v1275_v32 = vld [vmem:[%s2849_s8 + $0x18] sm:$0xff]  ;;  %p2050_p12 = por %p2049_p11, %p2048_p10 }
  0x9d   : > { %p2051_p0 = pnand %p2050_p12, %p2044_p9 }
  0x9f   : > { %2010 = vset.pattern.permute.xlu1 %v2148_v4 }
  0xa0   : > { %807 = vperm.xlu1 %2010, %v442_v46  }
  0xa4   : > { %2011 = vset.pattern.permute.xlu1 %v2151_v23 }
  0xa5   : > { %705 = vperm.xlu1 %2011, %v443_v62  }
  0xa9   : > { %2012 = vset.pattern.permute.xlu1 %v2150_v15 }
  0xaa   : > { %904 = vperm.xlu1 %2012, %v2335_v18  }
  0xae   : > { %908 = vperm.xlu1 %2012, %v442_v46  }
  0xb2   : > { %2013 = vset.pattern.permute.xlu1 %v2148_v4 }
  0xb3   : > { %811 = vperm.xlu1 %2013, %v443_v62  }
  0xb7   : > { %815 = vperm.xlu1 %2013, %v2365_v33  }
  0xbb   : > { %2015 = vset.pattern.permute.xlu1 %v2149_v8 }
  0xbc   : > { %1009 = vperm.xlu1 %2015, %v442_v46   ;;  %v2461_v63 = vpop.permute.xlu1 %771  ;;  %v2463_v0 = vpop.permute.xlu0 %977 }
  0xc0   : > { %2017 = vset.pattern.permute.xlu1 %v2150_v15  ;;  %v2466_v1 = vpop.permute.xlu1 %775  ;;  %v2468_v2 = vpop.permute.xlu0 %981 }
  0xc1   : > { %912 = vperm.xlu1 %2017, %v443_v62  }
  0xc4   : > { %v2474_v5 = vpop.permute.xlu0 %1001 }
  0xc5   : > { %2018 = vset.pattern.permute.xlu1 %v2151_v23  ;;  %v2471_v3 = vpop.permute.xlu1 %872 }
  0xc6   : > { %720 = vperm.xlu1 %2018, %v2415_v47  }
  0xc8   : > { %v2479_v7 = vpop.permute.xlu0 %1005 }
  0xc9   : > { %v2476_v6 = vpop.permute.xlu1 %876 }
  0xca   : > { %2019 = vset.pattern.permute.xlu1 %v2148_v4 }
  0xcb   : > { %819 = vperm.xlu1 %2019, %v2369_v34  }
  0xce   : > { %v2482_v9 = vpop.permute.xlu1 %973 }
  0xcf   : > { %2020 = vset.pattern.permute.xlu1 %v2149_v8  ;;  %v2485_v10 = vpop.permute.xlu0 %655 }
  0xd0   : > { %1013 = vperm.xlu1 %2020, %v443_v62   ;;  %v737_v61 = vmul.f32 %v2599_v56, %v2485_v10  ;;  %v939_v10 = vmul.f32 %v2609_v58, %v2471_v3 }
  0xd3   : > { %v2487_v11 = vpop.permute.xlu1 %783  ;;  %v2490_v12 = vpop.permute.xlu0 %660 }
  0xd4   : > { %1017 = vperm.xlu1 %2020, %v2365_v33   ;;  %v738_v59 = vmul.f32 %v2599_v56, %v2490_v12  ;;  %v1041_v12 = vmul.f32 %v2616_v60, %v2463_v0  ;;  %v1040_v0 = vmul.f32 %v2616_v60, %v2482_v9  ;;  %v841_v3 = vmul.f32 %v2594_v55, %v2487_v11 }
  0xd7   : > { %v2497_v16 = vpop.permute.xlu0 %665 }
  0xd8   : > { %2021 = vset.pattern.permute.xlu1 %v2151_v23  ;;  %v2493_v13 = vpop.permute.xlu1 %675  ;;  %v739_v39 = vmul.f32 %v2599_v56, %v2497_v16 }
  0xd9   : > { %725 = vperm.xlu1 %2021, %v2425_v51  }
  0xdb   : > { %v2505_v19 = vpop.permute.xlu0 %670 }
  0xdd   : > { %730 = vperm.xlu1 %2021, %v448_v14   ;;  %v2499_v17 = vpop.permute.xlu1 %880 }
  0xde   : > { %v941_v9 = vmul.f32 %v2609_v58, %v2499_v17 }
  0xdf   : > { %v2511_v21 = vpop.permute.xlu0 %680 }
  0xe1   : > { %2023 = vset.pattern.permute.xlu1 %v2150_v15  ;;  %v2502_v18 = vpop.permute.xlu1 %884 }
  0xe2   : > { %924 = vperm.xlu1 %2023, %v2415_v47   ;;  %v1892_v47 = vpack.c.bf16 %v1281_v44, %v1280_v43 }
  0xe3   : > { %v2516_v23 = vpop.permute.xlu0 %685 }
  0xe6   : > { %2024 = vset.pattern.permute.xlu1 %v2149_v8  ;;  %v2508_v20 = vpop.permute.xlu1 %787 }
  0xe7   : > { %1021 = vperm.xlu1 %2024, %v2369_v34   ;;  %v2524_v26 = vpop.permute.xlu0 %710  ;;  %v1276_v34 = vld [vmem:[%s2849_s8 + $0x20] sm:$0xff]  ;;  %v842_v17 = vmul.f32 %v2594_v55, %v2508_v20 }
  0xe8   : > { %v1884_v37 = vpack.c.bf16 %v1277_v35, %v1276_v34  ;;  %v740_v35 = vmul.f32 %v2599_v56, %v2505_v19  ;;  %v742_v19 = vmul.f32 %v2599_v56, %v2511_v21  ;;  %v743_v21 = vmul.f32 %v2599_v56, %v2516_v23 }
  0xea   : > { %v2513_v22 = vpop.permute.xlu1 %791 }
  0xeb   : > { %2025 = vset.pattern.permute.xlu1 %v2148_v4  ;;  %v2529_v4 = vpop.permute.xlu0 %715 }
  0xec   : > { %831 = vperm.xlu1 %2025, %v448_v14  }
  0xef   : > { %v2518_v24 = vpop.permute.xlu1 %985 }
  0xf0   : > { %2027 = vset.pattern.permute.xlu1 %v2150_v15  ;;  %v2533_v29 = vpop.permute.xlu0 %892  ;;  %v1272_v15 = vld [vmem:[%s2849_s8] sm:$0xff] }
  0xf1   : > { %928 = vperm.xlu1 %2027, %v2425_v51   ;;  %v1876_v31 = vpack.c.bf16 %v1273_v30, %v1272_v15  ;;  %v1896_v51 = vpack.c.bf16 %v1283_v49, %v1282_v48  ;;  %v1900_v15 = vpack.c.bf16 %v1285_v54, %v1284_v53  ;;  %v838_v30 = vmul.f32 %v2594_v55, %v2461_v63 }
  0xf2   : > { %v940_v63 = vmul.f32 %v2609_v58, %v2476_v6  ;;  %v843_v54 = vmul.f32 %v2594_v55, %v2513_v22 }
  0xf3   : > { %1877 = vmatprep.subr.bf16.mxu0 %v1876_v31 }
  0xf4   : > { %v2522_v25 = vpop.permute.xlu1 %888  ;;  %1879 = vmatpush3.bf16.msra.mxu0 %v1876_v31  ;;  %v2555_v38 = vpop.permute.xlu0 %896 }
  0xf5   : > { %932 = vperm.xlu1 %2027, %v448_v14  }
  0xf8   : > { %v2573_v46 = vpop.permute.xlu0 %916 }
  0xf9   : > { %2028 = vset.pattern.permute.xlu1 %v2149_v8  ;;  %v2527_v27 = vpop.permute.xlu1 %690  ;;  %v1274_v8 = vld [vmem:[%s2849_s8 + $0x10] sm:$0xff] }
  0xfa   : > { %1033 = vperm.xlu1 %2028, %v448_v14   ;;  %v1880_v33 = vpack.c.bf16 %v1275_v32, %v1274_v8  ;;  %v839_v32 = vmul.f32 %v2594_v55, %v2466_v1 }
  0xfc   : > { %1881 = vmatprep.subr.bf16.mxu0 %v1880_v33  ;;  %v2583_v52 = vpop.permute.xlu0 %920 }
  0xfd   : > { %1883 = vmatpush3.bf16.msra.mxu0 %v1880_v33  ;;  %v2633_v33 = vmul.f32 %v2616_v60, %v2468_v2  ;;  %v741_v2 = vmul.f32 %v2599_v56, %v2493_v13  ;;  %v942_v13 = vmul.f32 %v2609_v58, %v2502_v18  ;;  %v1043_v18 = vmul.f32 %v2616_v60, %v2518_v24 }
  0xfe   : > { %v2531_v28 = vpop.permute.xlu1 %795  ;;  %1885 = vmatprep.subr.bf16.mxu0 %v1884_v37 }
 0x101   : > { %1887 = vmatpush3.bf16.msra.mxu0 %v1884_v37  ;;  %v780_v1 = vpop.permute.xlu0 %779 }
 0x102   : > { %1889 = vmatprep.subr.bf16.mxu0 %v1888_v42 }
 0x103   : > { %v2553_v36 = vpop.permute.xlu1 %989 }
 0x105   : > { %1891 = vmatpush3.bf16.msra.mxu0 %v1888_v42 }
 0x106   : > { %1893 = vmatprep.subr.bf16.mxu0 %v1892_v47 }
 0x107   : > { %v2563_v41 = vpop.permute.xlu1 %993 }
 0x109   : > { %1895 = vmatpush3.bf16.msra.mxu0 %v1892_v47  ;;  %v840_v47 = vmul.f32 %v2594_v55, %v780_v1 }
 0x10a   : > { %1897 = vmatprep.subr.bf16.mxu0 %v1896_v51 }
 0x10c   : > { %v2571_v45 = vpop.permute.xlu1 %695 }
 0x10d   : > { %1899 = vmatpush3.bf16.msra.mxu0 %v1896_v51  ;;  %v800_v51 = vpop.permute.xlu0 %799 }
 0x10e   : > { %1901 = vmatprep.subr.bf16.mxu0 %v1900_v15 }
 0x110   : > { %v2581_v50 = vpop.permute.xlu1 %700 }
 0x111   : > { %1903 = vmatpush3.bf16.msra.mxu0 %v1900_v15  ;;  %v943_v15 = vmul.f32 %v2609_v58, %v2522_v25 }
 0x115   : > { %v2620_v62 = vpop.permute.xlu1 %900 }
 0x11a   : > { %v2653_v44 = vpop.permute.xlu1 %997 }
 0x11d   : > { %v1706_v14 = vpop.f32.mrb[0].mxu0 }
 0x11e   : > { %v579_v8 = vadd.f32 %v1706_v14, %v2604_v57  ;;  %v573_v31 = vpop.f32.mrb[1].mxu0 }
 0x11f   : > { %v574_v34 = vadd.f32 %v2604_v57, %v573_v31 }
 0x120   : > { %v754_v37 = vadd.f32 %v738_v59, %v579_v8 }
 0x121   : > { %v753_v40 = vadd.f32 %v737_v61, %v574_v34  ;;  %v1709_v6 = vpop.f32.mrb[2].mxu0  ;;  %v2673_v34 = vpop.permute.xlu1 %807 }
 0x122   : > { %v855_v42 = vadd.f32 %v839_v32, %v754_v37  ;;  %v589_v43 = vadd.f32 %v1709_v6, %v2604_v57  ;;  %v583_v11 = vpop.f32.mrb[3].mxu0 }
 0x123   : > { %v584_v16 = vadd.f32 %v2604_v57, %v583_v11  ;;  %v854_v48 = vadd.f32 %v838_v30, %v753_v40  ;;  %v944_v30 = vmul.f32 %v2609_v58, %v2533_v29  ;;  %v945_v29 = vmul.f32 %v2609_v58, %v2555_v38 }
 0x124   : > { %v756_v49 = vadd.f32 %v740_v35, %v589_v43  ;;  %v956_v53 = vadd.f32 %v940_v63, %v855_v42 }
 0x125   : > { %v755_v59 = vadd.f32 %v739_v39, %v584_v16  ;;  %v1712_v61 = vpop.f32.mrb[4].mxu0  ;;  %v955_v14 = vadd.f32 %v939_v10, %v854_v48  ;;  %v744_v10 = vmul.f32 %v2599_v56, %v2527_v27  ;;  %v844_v27 = vmul.f32 %v2594_v55, %v2531_v28  ;;  %v2689_v16 = vpop.permute.xlu1 %705 }
 0x126   : > { %v857_v20 = vadd.f32 %v841_v3, %v756_v49  ;;  %v599_v8 = vadd.f32 %v1712_v61, %v2604_v57  ;;  %v593_v23 = vpop.f32.mrb[5].mxu0  ;;  %v1057_v31 = vadd.f32 %v1041_v12, %v956_v53  ;;  %v845_v3 = vmul.f32 %v2594_v55, %v800_v51 }
 0x127   : > { %v856_v32 = vadd.f32 %v840_v47, %v755_v59  ;;  %v594_v22 = vadd.f32 %v2604_v57, %v593_v23  ;;  %v1056_v24 = vadd.f32 %v1040_v0, %v955_v14  ;;  %v804_v0 = vpop.permute.xlu0 %803  ;;  %v1047_v14 = vmul.f32 %v2616_v60, %v2474_v5 }
 0x128   : > { %v758_v63 = vadd.f32 %v742_v19, %v599_v8  ;;  %v958_v35 = vadd.f32 %v942_v13, %v857_v20  ;;  %v1073_v42 = vmax.f32 %v1057_v31, 0.0  ;;  %v1045_v19 = vmul.f32 %v2616_v60, %v2563_v41 }
 0x129   : > { %v957_v37 = vadd.f32 %v941_v9, %v856_v32  ;;  %v757_v1 = vadd.f32 %v741_v2, %v594_v22  ;;  %v1715_v12 = vpop.f32.mrb[6].mxu0  ;;  %v1072_v25 = vmax.f32 %v1056_v24, 0.0  ;;  %v1044_v9 = vmul.f32 %v2616_v60, %v2553_v36  ;;  %v905_v23 = vpop.permute.xlu1 %904 }
 0x12a   : > { %v859_v39 = vadd.f32 %v843_v54, %v758_v63  ;;  %v609_v40 = vadd.f32 %v1715_v12, %v2604_v57  ;;  %v603_v6 = vpop.f32.mrb[7].mxu0  ;;  %v1059_v43 = vadd.f32 %v1043_v18, %v958_v35  ;;  %v745_v41 = vmul.f32 %v2599_v56, %v2571_v45 }
 0x12b   : > { %v858_v11 = vadd.f32 %v842_v17, %v757_v1  ;;  %v604_v38 = vadd.f32 %v2604_v57, %v603_v6  ;;  %1760 = vmatprep.mubr.f32.mxu1 %v1072_v25  ;;  %v1058_v2 = vadd.f32 %v2633_v33, %v957_v37  ;;  %v846_v17 = vmul.f32 %v2594_v55, %v804_v0 }
 0x12c   : > { %v760_v13 = vadd.f32 %v744_v10, %v609_v40  ;;  %1761 = vmatmul.mubr.f32.vlgmr.msra.gmra.mrb[0].mxu1 %v1073_v42  ;;  %v960_v47 = vadd.f32 %v944_v30, %v859_v39  ;;  %v946_v33 = vmul.f32 %v2609_v58, %v2620_v62  ;;  %v1075_v36 = vmax.f32 %v1059_v43, 0.0 }
 0x12d   : > { %v759_v48 = vadd.f32 %v743_v21, %v604_v38  ;;  %v1718_v49 = vpop.f32.mrb[8].mxu0  ;;  %v1074_v28 = vmax.f32 %v1058_v2, 0.0  ;;  %v959_v51 = vadd.f32 %v943_v15, %v858_v11  ;;  %v748_v30 = vmul.f32 %v2599_v56, %v2524_v26  ;;  %v909_v1 = vpop.permute.xlu1 %908 }
 0x12e   : > { %v861_v53 = vadd.f32 %v845_v3, %v760_v13  ;;  %v613_v54 = vpop.f32.mrb[9].mxu0  ;;  %v1061_v18 = vadd.f32 %v1045_v19, %v960_v47  ;;  %v1046_v62 = vmul.f32 %v2616_v60, %v2653_v44  ;;  %v947_v32 = vmul.f32 %v2609_v58, %v905_v23 }
 0x12f   : > { %v860_v59 = vadd.f32 %v844_v27, %v759_v48  ;;  %v614_v61 = vadd.f32 %v2604_v57, %v613_v54  ;;  %1763 = vmatprep.mubr.f32.mxu1 %v1074_v28  ;;  %v1060_v21 = vadd.f32 %v1044_v9, %v959_v51  ;;  %v1048_v44 = vmul.f32 %v2616_v60, %v2479_v7 }
 0x130   : > { %v962_v20 = vadd.f32 %v946_v33, %v861_v53  ;;  %1764 = vmatmul.mubr.f32.gmra.mrb[2].mxu1 %v1075_v36  ;;  %v1077_v10 = vmax.f32 %v1061_v18, 0.0  ;;  %v749_v40 = vmul.f32 %v2599_v56, %v2529_v4  ;;  %v619_v7 = vadd.f32 %v1718_v49, %v2604_v57 }
 0x131   : > { %v761_v8 = vadd.f32 %v745_v41, %v614_v61  ;;  %v1721_v31 = vpop.f32.mrb[10].mxu0  ;;  %v1076_v45 = vmax.f32 %v1060_v21, 0.0  ;;  %v961_v15 = vadd.f32 %v945_v29, %v860_v59  ;;  %v746_v4 = vmul.f32 %v2599_v56, %v2581_v50 }
 0x132   : > { %v629_v22 = vadd.f32 %v1721_v31, %v2604_v57  ;;  %v623_v24 = vpop.f32.mrb[11].mxu0  ;;  %v1063_v5 = vadd.f32 %v1047_v14, %v962_v20  ;;  %v812_v11 = vpop.permute.xlu1 %811  ;;  %v847_v47 = vmul.f32 %v2594_v55, %v2673_v34  ;;  %v948_v48 = vmul.f32 %v2609_v58, %v909_v1 }
 0x133   : > { %v862_v63 = vadd.f32 %v846_v17, %v761_v8  ;;  %1766 = vmatprep.mubr.f32.mxu1 %v1076_v45  ;;  %v1062_v26 = vadd.f32 %v1046_v62, %v961_v15  ;;  %v762_v19 = vadd.f32 %v746_v4, %v619_v7  ;;  %v624_v18 = vadd.f32 %v2604_v57, %v623_v24 }
 0x134   : > { %v764_v35 = vadd.f32 %v748_v30, %v629_v22  ;;  %1767 = vmatmul.mubr.f32.gmra.mrb[4].mxu1 %v1077_v10  ;;  %v1079_v39 = vmax.f32 %v1063_v5, 0.0  ;;  %v747_v50 = vmul.f32 %v2599_v56, %v2689_v16  ;;  %v848_v41 = vmul.f32 %v2594_v55, %v812_v11 }
 0x135   : > { %v963_v37 = vadd.f32 %v947_v32, %v862_v63  ;;  %v1724_v12 = vpop.f32.mrb[12].mxu0  ;;  %v1078_v3 = vmax.f32 %v1062_v26, 0.0  ;;  %v863_v28 = vadd.f32 %v847_v47, %v762_v19  ;;  %v951_v59 = vmul.f32 %v2609_v58, %v2583_v52  ;;  %v824_v26 = vpop.permute.xlu0 %823 }
 0x136   : > { %v639_v29 = vadd.f32 %v1724_v12, %v2604_v57  ;;  %v633_v25 = vpop.f32.mrb[13].mxu0  ;;  %v816_v13 = vpop.permute.xlu1 %815  ;;  %v763_v21 = vadd.f32 %v747_v50, %v624_v18  ;;  %v950_v16 = vmul.f32 %v2609_v58, %v2573_v46  ;;  %v851_v1 = vmul.f32 %v2594_v55, %v824_v26  ;;  %v1286_v50 = vld [vmem:[%s2849_s8 + $0x70] sm:$0xff] }
 0x137   : > { %v634_v6 = vadd.f32 %v2604_v57, %v633_v25  ;;  %1769 = vmatprep.mubr.f32.mxu1 %v1078_v3  ;;  %v1064_v42 = vadd.f32 %v1048_v44, %v963_v37  ;;  %v964_v17 = vadd.f32 %v948_v48, %v863_v28  ;;  %v849_v14 = vmul.f32 %v2594_v55, %v816_v13 }
 0x138   : > { %1770 = vmatmul.mubr.f32.gmra.mrb[6].mxu1 %v1079_v39  ;;  %v864_v62 = vadd.f32 %v848_v41, %v763_v21  ;;  %v1287_v41 = vld [vmem:[%s2849_s8 + $0x78] sm:$0xff]  ;;  %v1609_v21 = vld [vmem:[%s2848_s7] ss:$0 sm:$0xff] }
 0x139   : > { %v765_v0 = vadd.f32 %v749_v40, %v634_v6  ;;  %v1080_v43 = vmax.f32 %v1064_v42, 0.0  ;;  %v1727_v27 = vpop.f32.mrb[14].mxu0  ;;  %v865_v23 = vadd.f32 %v849_v14, %v764_v35  ;;  %v828_v46 = vpop.permute.xlu0 %827 }
 0x13a   : > { %v2713_v38 = vadd.f32 %v1727_v27, %v2604_v57  ;;  %v643_v2 = vpop.f32.mrb[15].mxu0  ;;  %v852_v19 = vmul.f32 %v2594_v55, %v828_v46 }
 0x13b   : > { %1772 = vmatprep.mubr.f32.mxu1 %v1080_v43  ;;  %v644_v9 = vadd.f32 %v2604_v57, %v643_v2  ;;  %v1010_v49 = vpop.permute.xlu1 %1009  ;;  %v966_v22 = vadd.f32 %v950_v16, %v865_v23 }
 0x13c   : > { %v1049_v51 = vmul.f32 %v2616_v60, %v1010_v49 }
 0x13d   : > { %v1026_v3 = vpop.permute.xlu0 %1025 }
 0x13e   : > { %v1065_v33 = vadd.f32 %v1049_v51, %v964_v17  ;;  %v1053_v6 = vmul.f32 %v2616_v60, %v1026_v3 }
 0x140   : > { %v1081_v53 = vmax.f32 %v1065_v33, 0.0  ;;  %v913_v54 = vpop.permute.xlu1 %912 }
 0x141   : > { %v949_v30 = vmul.f32 %v2609_v58, %v913_v54  ;;  %v1030_v13 = vpop.permute.xlu0 %1029 }
 0x142   : > { %1773 = vmatmul.mubr.f32.gmra.mrb[8].mxu1 %v1081_v53  ;;  %v1054_v49 = vmul.f32 %v2616_v60, %v1030_v13 }
 0x143   : > { %v965_v31 = vadd.f32 %v949_v30, %v864_v62 }
 0x145   : > { %v721_v36 = vpop.permute.xlu1 %720 }
 0x146   : > { %v750_v44 = vmul.f32 %v2599_v56, %v721_v36 }
 0x148   : > { %v766_v35 = vadd.f32 %v750_v44, %v639_v29 }
 0x14a   : > { %v820_v34 = vpop.permute.xlu1 %819  ;;  %v867_v25 = vadd.f32 %v851_v1, %v766_v35 }
 0x14b   : > { %v850_v61 = vmul.f32 %v2594_v55, %v820_v34 }
 0x14d   : > { %v866_v20 = vadd.f32 %v850_v61, %v765_v0 }
 0x14f   : > { %v1014_v8 = vpop.permute.xlu1 %1013  ;;  %v967_v57 = vadd.f32 %v951_v59, %v866_v20 }
 0x150   : > { %v1050_v45 = vmul.f32 %v2616_v60, %v1014_v8 }
 0x152   : > { %v1066_v15 = vadd.f32 %v1050_v45, %v965_v31 }
 0x153   : > { %v1018_v52 = vpop.permute.xlu1 %1017 }
 0x154   : > { %v1082_v32 = vmax.f32 %v1066_v15, 0.0  ;;  %v1051_v24 = vmul.f32 %v2616_v60, %v1018_v52 }
 0x156   : > { %v1067_v10 = vadd.f32 %v1051_v24, %v966_v22  ;;  %1775 = vmatprep.mubr.f32.mxu1 %v1082_v32 }
 0x158   : > { %v1083_v5 = vmax.f32 %v1067_v10, 0.0  ;;  %v726_v63 = vpop.permute.xlu1 %725 }
 0x159   : > { %v751_v27 = vmul.f32 %v2599_v56, %v726_v63 }
 0x15a   : > { %1776 = vmatmul.mubr.f32.gmra.mrb[10].mxu1 %v1083_v5 }
 0x15b   : > { %v767_v4 = vadd.f32 %v751_v27, %v644_v9 }
 0x15c   : > { %v731_v37 = vpop.permute.xlu1 %730 }
 0x15d   : > { %v868_v48 = vadd.f32 %v852_v19, %v767_v4  ;;  %v752_v17 = vmul.f32 %v2599_v56, %v731_v37  ;;  %v1904_v56 = vpack.c.bf16 %v1287_v41, %v1286_v50 }
 0x15f   : > { %v768_v9 = vadd.f32 %v752_v17, %v2713_v38  ;;  %1905 = vmatprep.subr.bf16.mxu0 %v1904_v56 }
 0x160   : > { %1907 = vmatpush3.bf16.msra.mxu0 %v1904_v56 }
 0x161   : > { %v925_v12 = vpop.permute.xlu1 %924 }
 0x162   : > { %v952_v39 = vmul.f32 %v2609_v58, %v925_v12 }
 0x164   : > { %v968_v40 = vadd.f32 %v952_v39, %v867_v25 }
 0x166   : > { %v1022_v42 = vpop.permute.xlu1 %1021  ;;  %v1069_v43 = vadd.f32 %v1053_v6, %v968_v40 }
 0x167   : > { %v1052_v0 = vmul.f32 %v2616_v60, %v1022_v42 }
 0x168   : > { %v1085_v29 = vmax.f32 %v1069_v43, 0.0 }
 0x169   : > { %v1068_v7 = vadd.f32 %v1052_v0, %v967_v57 }
 0x16b   : > { %v1084_v11 = vmax.f32 %v1068_v7, 0.0  ;;  %v832_v2 = vpop.permute.xlu1 %831 }
 0x16c   : > { %v853_v33 = vmul.f32 %v2594_v55, %v832_v2 }
 0x16d   : > { %1778 = vmatprep.mubr.f32.mxu1 %v1084_v11 }
 0x16e   : > { %1779 = vmatmul.mubr.f32.gmra.mrb[12].mxu1 %v1085_v29  ;;  %v869_v34 = vadd.f32 %v853_v33, %v768_v9  ;;  %v1610_v33 = vld [vmem:[%s2850_s9] ss:$0 sm:$0xff] }
 0x170   : > { %v929_v47 = vpop.permute.xlu1 %928 }
 0x171   : > { %v953_v28 = vmul.f32 %v2609_v58, %v929_v47 }
 0x173   : > { %v969_v51 = vadd.f32 %v953_v28, %v868_v48 }
 0x174   : > { %v933_v53 = vpop.permute.xlu1 %932 }
 0x175   : > { %v1070_v54 = vadd.f32 %v1054_v49, %v969_v51  ;;  %v954_v36 = vmul.f32 %v2609_v58, %v933_v53 }
 0x177   : > { %v1086_v18 = vmax.f32 %v1070_v54, 0.0  ;;  %v970_v55 = vadd.f32 %v954_v36, %v869_v34 }
 0x179   : > { %v1034_v59 = vpop.permute.xlu1 %1033  ;;  %1781 = vmatprep.mubr.f32.mxu1 %v1086_v18 }
 0x17a   : > { %v1055_v61 = vmul.f32 %v2616_v60, %v1034_v59 }
 0x17c   : > { %v1071_v38 = vadd.f32 %v1055_v61, %v970_v55 }
 0x17e   : > { %v1087_v58 = vmax.f32 %v1071_v38, 0.0 }
 0x180   : > { %1782 = vmatmul.mubr.f32.gmra.mrb[14].mxu1 %v1087_v58 }
 0x1ff   : > { %v1762_v14 = vpop.f32.mrb[0].mxu1 }
 0x200   : > { %v1183_v30 = vadd.f32 %v1762_v14, %v1609_v21  ;;  %v1177_v20 = vpop.f32.mrb[1].mxu1 }
 0x201   : > { %v1178_v62 = vadd.f32 %v1609_v21, %v1177_v20 }
 0x202   : > { %v1257_v16 = vmax.f32 %v1183_v30, 0.0 }
 0x203   : > { %v1256_v8 = vmax.f32 %v1178_v62, 0.0  ;;  %v1765_v57 = vpop.f32.mrb[2].mxu1 }
 0x204   : > { %v1193_v23 = vadd.f32 %v1765_v57, %v1609_v21  ;;  %v1187_v31 = vpop.f32.mrb[3].mxu1 }
 0x205   : > { %v1188_v45 = vadd.f32 %v1609_v21, %v1187_v31  ;;  %1816 = vmatprep.mubr.f32.mxu0 %v1256_v8 }
 0x206   : > { %1817 = vmatmul.mubr.f32.vlgmr.msra.gmra.mrb[16].mxu0 %v1257_v16  ;;  %v1259_v52 = vmax.f32 %v1193_v23, 0.0 }
 0x207   : > { %v1258_v60 = vmax.f32 %v1188_v45, 0.0  ;;  %v1768_v15 = vpop.f32.mrb[4].mxu1 }
 0x208   : > { %v1203_v32 = vadd.f32 %v1768_v15, %v1609_v21  ;;  %v1197_v22 = vpop.f32.mrb[5].mxu1 }
 0x209   : > { %v1198_v24 = vadd.f32 %v1609_v21, %v1197_v22  ;;  %1819 = vmatprep.mubr.f32.mxu0 %v1258_v60 }
 0x20a   : > { %1820 = vmatmul.mubr.f32.gmra.mrb[18].mxu0 %v1259_v52  ;;  %v1261_v63 = vmax.f32 %v1203_v32, 0.0 }
 0x20b   : > { %v1260_v10 = vmax.f32 %v1198_v24, 0.0  ;;  %v1771_v5 = vpop.f32.mrb[6].mxu1 }
 0x20c   : > { %v1213_v26 = vadd.f32 %v1771_v5, %v1609_v21  ;;  %v1207_v44 = vpop.f32.mrb[7].mxu1 }
 0x20d   : > { %v1208_v37 = vadd.f32 %v1609_v21, %v1207_v44  ;;  %1822 = vmatprep.mubr.f32.mxu0 %v1260_v10 }
 0x20e   : > { %1823 = vmatmul.mubr.f32.gmra.mrb[20].mxu0 %v1261_v63  ;;  %v1263_v35 = vmax.f32 %v1213_v26, 0.0 }
 0x20f   : > { %v1262_v46 = vmax.f32 %v1208_v37, 0.0 }
 0x211   : > { %1825 = vmatprep.mubr.f32.mxu0 %v1262_v46 }
 0x212   : > { %1826 = vmatmul.mubr.f32.gmra.mrb[22].mxu0 %v1263_v35 }
 0x215   : > { %v1774_v1 = vpop.f32.mrb[8].mxu1 }
 0x216   : > { %v1223_v12 = vadd.f32 %v1774_v1, %v1609_v21  ;;  %v1217_v3 = vpop.f32.mrb[9].mxu1 }
 0x217   : > { %v1218_v25 = vadd.f32 %v1609_v21, %v1217_v3 }
 0x218   : > { %v1265_v40 = vmax.f32 %v1223_v12, 0.0 }
 0x219   : > { %v1264_v39 = vmax.f32 %v1218_v25, 0.0 }
 0x21b   : > { %1828 = vmatprep.mubr.f32.mxu0 %v1264_v39 }
 0x21c   : > { %1829 = vmatmul.mubr.f32.gmra.mrb[24].mxu0 %v1265_v40 }
 0x22d   : > { %v1777_v6 = vpop.f32.mrb[10].mxu1 }
 0x22e   : > { %v1233_v42 = vadd.f32 %v1777_v6, %v1609_v21  ;;  %v1227_v0 = vpop.f32.mrb[11].mxu1 }
 0x22f   : > { %v1228_v43 = vadd.f32 %v1609_v21, %v1227_v0 }
 0x230   : > { %v1267_v7 = vmax.f32 %v1233_v42, 0.0 }
 0x231   : > { %v1266_v27 = vmax.f32 %v1228_v43, 0.0 }
 0x233   : > { %1831 = vmatprep.mubr.f32.mxu0 %v1266_v27 }
 0x234   : > { %1832 = vmatmul.mubr.f32.gmra.mrb[26].mxu0 %v1267_v7 }
 0x241   : > { %v1780_v11 = vpop.f32.mrb[12].mxu1 }
 0x242   : > { %v1243_v2 = vadd.f32 %v1780_v11, %v1609_v21  ;;  %v1237_v29 = vpop.f32.mrb[13].mxu1 }
 0x243   : > { %v1238_v4 = vadd.f32 %v1609_v21, %v1237_v29 }
 0x244   : > { %v1269_v13 = vmax.f32 %v1243_v2, 0.0 }
 0x245   : > { %v1268_v19 = vmax.f32 %v1238_v4, 0.0 }
 0x247   : > { %1834 = vmatprep.mubr.f32.mxu0 %v1268_v19 }
 0x248   : > { %1835 = vmatmul.mubr.f32.gmra.mrb[28].mxu0 %v1269_v13 }
 0x253   : > { %v1783_v47 = vpop.f32.mrb[14].mxu1 }
 0x254   : > { %v1253_v48 = vadd.f32 %v1783_v47, %v1609_v21  ;;  %v1247_v28 = vpop.f32.mrb[15].mxu1 }
 0x255   : > { %v1248_v49 = vadd.f32 %v1609_v21, %v1247_v28 }
 0x256   : > { %v1271_v51 = vmax.f32 %v1253_v48, 0.0 }
 0x257   : > { %v1270_v17 = vmax.f32 %v1248_v49, 0.0 }
 0x259   : > { %1837 = vmatprep.mubr.f32.mxu0 %v1270_v17 }
 0x25a   : > { %1838 = vmatmul.mubr.f32.gmra.mrb[30].mxu0 %v1271_v51 }
 0x2d9   : > { %v1818_v53 = vpop.f32.mrb[16].mxu0 }
 0x2da   : > { %v1367_v54 = vadd.f32 %v1818_v53, %v1610_v33  ;;  %v1361_v9 = vpop.f32.mrb[17].mxu0 }
 0x2db   : > { %v1362_v36 = vadd.f32 %v1610_v33, %v1361_v9 }
 0x2dc   : > { %1441 = vst [vmem:[%s2305_s18 + $0x8] sm:$0xff] %v1367_v54 }
 0x2dd   : > { %1440 = vst [vmem:[%s2305_s18] sm:$0xff] %v1362_v36  ;;  %v1821_v18 = vpop.f32.mrb[18].mxu0 }
 0x2de   : > { %v1377_v50 = vadd.f32 %v1821_v18, %v1610_v33  ;;  %v1371_v41 = vpop.f32.mrb[19].mxu0 }
 0x2df   : > { %v1372_v34 = vadd.f32 %v1610_v33, %v1371_v41 }
 0x2e0   : > { %1443 = vst [vmem:[%s2305_s18 + $0x18] sm:$0xff] %v1377_v50 }
 0x2e1   : > { %1442 = vst [vmem:[%s2305_s18 + $0x10] sm:$0xff] %v1372_v34  ;;  %v1824_v56 = vpop.f32.mrb[20].mxu0 }
 0x2e2   : > { %v1387_v59 = vadd.f32 %v1824_v56, %v1610_v33  ;;  %v1381_v55 = vpop.f32.mrb[21].mxu0 }
 0x2e3   : > { %v1382_v61 = vadd.f32 %v1610_v33, %v1381_v55 }
 0x2e4   : > { %1445 = vst [vmem:[%s2305_s18 + $0x28] sm:$0xff] %v1387_v59 }
 0x2e5   : > { %1444 = vst [vmem:[%s2305_s18 + $0x20] sm:$0xff] %v1382_v61  ;;  %v1827_v38 = vpop.f32.mrb[22].mxu0 }
 0x2e6   : > { %v1397_v58 = vadd.f32 %v1827_v38, %v1610_v33  ;;  %v1391_v21 = vpop.f32.mrb[23].mxu0 }
 0x2e7   : > { %v1392_v14 = vadd.f32 %v1610_v33, %v1391_v21 }
 0x2e8   : > { %1447 = vst [vmem:[%s2305_s18 + $0x38] sm:$0xff] %v1397_v58 }
 0x2e9   : > { %1446 = vst [vmem:[%s2305_s18 + $0x30] sm:$0xff] %v1392_v14 }
 0x2ef   : > { %v1830_v30 = vpop.f32.mrb[24].mxu0 }
 0x2f0   : > { %v1407_v20 = vadd.f32 %v1830_v30, %v1610_v33  ;;  %v1401_v62 = vpop.f32.mrb[25].mxu0 }
 0x2f1   : > { %v1402_v8 = vadd.f32 %v1610_v33, %v1401_v62 }
 0x2f2   : > { %1449 = vst [vmem:[%s2305_s18 + $0x48] sm:$0xff] %v1407_v20 }
 0x2f3   : > { %1448 = vst [vmem:[%s2305_s18 + $0x40] sm:$0xff] %v1402_v8 }
 0x307   : > { %v1833_v57 = vpop.f32.mrb[26].mxu0 }
 0x308   : > { %v1417_v16 = vadd.f32 %v1833_v57, %v1610_v33  ;;  %v1411_v23 = vpop.f32.mrb[27].mxu0 }
 0x309   : > { %v1412_v31 = vadd.f32 %v1610_v33, %v1411_v23 }
 0x30a   : > { %1451 = vst [vmem:[%s2305_s18 + $0x58] sm:$0xff] %v1417_v16 }
 0x30b   : > { %1450 = vst [vmem:[%s2305_s18 + $0x50] sm:$0xff] %v1412_v31 }
 0x31b   : > { %v1836_v45 = vpop.f32.mrb[28].mxu0 }
 0x31c   : > { %v1427_v60 = vadd.f32 %v1836_v45, %v1610_v33  ;;  %v1421_v15 = vpop.f32.mrb[29].mxu0 }
 0x31d   : > { %v1422_v52 = vadd.f32 %v1610_v33, %v1421_v15 }
 0x31e   : > { %1453 = vst [vmem:[%s2305_s18 + $0x68] sm:$0xff] %v1427_v60 }
 0x31f   : > { %1452 = vst [vmem:[%s2305_s18 + $0x60] sm:$0xff] %v1422_v52 }
 0x32d   : > { %v1839_v32 = vpop.f32.mrb[30].mxu0 }
 0x32e   : > { %v1437_v22 = vadd.f32 %v1839_v32, %v1610_v33  ;;  %v1431_v24 = vpop.f32.mrb[31].mxu0 }
 0x32f   : > { %v1432_v10 = vadd.f32 %v1610_v33, %v1431_v24 }
 0x330   : > { %1455 = vst [vmem:[%s2305_s18 + $0x78] sm:$0xff] %v1437_v22 }
 0x331   : > { %1454 = vst [vmem:[%s2305_s18 + $0x70] sm:$0xff] %v1432_v10 }
 0x332   : > { %2054 = shalt.err (!%p2051_p0)
}
 0x333   : > { %s2055_s18 = scalar_lea.hbm %s2781_s28, 2048  ;;  %s2059_s24 = scalar_lea.hbm %s2851_s10, 8192 }
 0x334   : > { %p2056_p1 = scmp.ne.s32.totalorder %s2781_s28, %s2055_s18  ;;  %p2060_p4 = scmp.lt.u32.totalorder %s2781_s28, %s2851_s10 }
 0x335   : > { %p2061_p5 = scmp.lt.u32.totalorder %s2059_s24, %s2055_s18  ;;  %p2063_p7 = scmp.lt.u32.totalorder %s2055_s18, %s2781_s28 }
 0x336   : > { %p2057_p2 = pnand %p2056_p1, %p2264_p8 }
 0x337   : > { %p2062_p6 = por %p2061_p5, %p2060_p4 }
 0x338   : > { %p2058_p3 = pneg %p2057_p2 }
 0x339   : > { %p2064_p9 = por %p2063_p7, %p2062_p6 }
 0x33b   : > { %p2065_p10 = pnand %p2064_p9, %p2058_p3 }
 0x33d   : > { %2068 = shalt.err (!%p2065_p10)
}
 0x33e   : > { %s2153_s23 = smov 128   ;;  %s2154_s20 = smov 8  }
 0x33f   : > { %1908 = dma.vmem_to_hbm [thread:$0]  (%p2264_p8), %s2783_s22, 2048, %s2781_s28, %s2789_s25, %s2153_s23, %s2153_s23, %s2154_s20  }
 0x340 PF: > { %s2878_s13 = sld [smem:[#allocation13_spill]]  ;;  %s2879_s14 = sld [smem:[#allocation9_spill]] }
 0x346   : > { %p1914_p11 = scmp.ge.s32.totalorder %s2878_s13, 2  ;;  %s1487_s11 = sand.u32 1, %s2879_s14  }
 0x347   : > { %s1488_s17 = scalar_lea.sflag [#allocation6], %s1487_s11 }
 0x348   : > { %p1911_p12 = pnand %p1914_p11, %p2273_p13 }
 0x34a   : > { %2108 = dma.done.wait (!%p1911_p12), %s1488_s17, 2048  }
 0x34b   : > { %2110 = vsyncadd (!%p1911_p12), %s1488_s17, 4294965248  ;;  %s29_s24 = sadd.s32 1, %s2878_s13   ;;  %s2881_s21 = sld [smem:[#allocation10_spill]] }
 0x34c   : > { %p26_p0 = scmp.ge.s32.totalorder %s29_s24, 6   ;;  %s2882_s0 = sld [smem:[#allocation17_spill]] }
 0x34d   : > { %s2883_s20 = sld [smem:[#allocation11_spill]]  ;;  %s2884_s30 = sld [smem:[#allocation12_spill]] }
 0x34e   : > { %s2885_s22 = sld [smem:[#allocation14_spill]]  ;;  %s2886_s23 = sld [smem:[#allocation15_spill]] }
 0x34f   : > { %s2887_s18 = smov %s2117_s19  ;;  %28 = sbr.rel (!%p26_p0) target bundleno = 21 (0x15), region = 114 }
 0x351   : > { %s2888_s19 = smov %s2881_s21 }
 0x353   : > { %s2889_s21 = smov %s2884_s30 }
 0x356   :  { %1493 = vsyncpa [#allocation6], 1 }
 0x357   :  { %1495 = vsyncpa [#allocation6 + $0x1], 1 }

</bundles_post_ra>
